<compile_context>
chip_gen: v6e
topology: v6e:2x2x1
jax: 0.10.0
libtpu: 0.0.40
codegen_flags: <defaults>
</compile_context>

<pallas_src>
import functools

import jax
import jax.numpy as jnp
from jax.experimental import pallas as pl
from jax.experimental.pallas import tpu as pltpu


_WEIGHT_RESIDENT_BYTES = 16 * 1024 * 1024   # above this, tile the K reduction


def _round_up(x, m):
    return ((x + m - 1) // m) * m


def _gelu(h, approx):
    if approx:
        # tanh-approx GELU -> EUP (otherwise idle slot); opt-in only.
        c = jnp.float32(0.7978845608028654)          # sqrt(2/pi)
        return 0.5 * h * (1.0 + jnp.tanh(c * (h + 0.044715 * (h * h * h))))
    # exact erf GELU (matches HuggingFace BERT ACT2FN["gelu"])
    return 0.5 * h * (1.0 + jax.lax.erf(h * jnp.float32(0.7071067811865476)))


def _epilogue(h, b, g, be, *, eps, skip_act, approx_gelu, apply_norm):
    # h: (rows, H) float32
    if b is not None:
        h = h + b
    if not skip_act:
        h = _gelu(h, approx_gelu)
    if apply_norm:
        mean = jnp.mean(h, axis=-1, keepdims=True)
        var = jnp.mean(jnp.square(h - mean), axis=-1, keepdims=True)
        h = (h - mean) * jax.lax.rsqrt(var + jnp.float32(eps))
        h = h * g + be
    return h


def _bert_head_transform_kernel(x_ref, w_ref, b_ref, g_ref, be_ref, o_ref,
                                acc_ref=None, *, eps, skip_act, approx_gelu,
                                add_bias, apply_norm, sub_m):
    # x_ref: (TM, KB)  w_ref: (KB, H)  b/g/be: (1, H)  o_ref: (TM, H)
    # acc_ref: (TM, H) f32 scratch, only present when K is tiled.
    multi_k = acc_ref is not None
    if multi_k:
        k = pl.program_id(1)
        nk = pl.num_programs(1)

        @pl.when(k == 0)
        def _init():
            acc_ref[...] = jnp.zeros_like(acc_ref)

    w = w_ref[...]                                           # native dtype (bf16 full-rate)
    b = b_ref[...].astype(jnp.float32) if add_bias else None
    g = g_ref[...].astype(jnp.float32)
    be = be_ref[...].astype(jnp.float32)

    tm = x_ref.shape[0]
    j = 0
    while j < tm:                                            # static sub-tiling (unrolled)
        rows = pl.ds(j, min(sub_m, tm - j))
        part = jax.lax.dot_general(
            x_ref[rows, :], w,
            dimension_numbers=(((1,), (0,)), ((), ())),
            preferred_element_type=jnp.float32)              # f32 accumulation
        if multi_k:
            acc_ref[rows, :] += part

            @pl.when(k == nk - 1)
            def _finish(rows=rows):
                h = acc_ref[rows, :]
                o_ref[rows, :] = _epilogue(
                    h, b, g, be, eps=eps, skip_act=skip_act,
                    approx_gelu=approx_gelu, apply_norm=apply_norm
                ).astype(o_ref.dtype)
        else:
            o_ref[rows, :] = _epilogue(
                part, b, g, be, eps=eps, skip_act=skip_act,
                approx_gelu=approx_gelu, apply_norm=apply_norm
            ).astype(o_ref.dtype)
        j += sub_m


def bert_head_transform(hidden_states, weight, bias=None, gamma=None, beta=None, *,
                        eps=1e-12, skip_act=False, use_bias=True, avg_w=None,
                        not_norm=False, approx_gelu=False,
                        block_m=512, block_k=None,
                        vmem_budget_bytes=44 * 1024 * 1024):
    """Forward pass of BertHeadTransform.

    hidden_states: (..., input_size)
    weight:        (hidden_size, input_size)   -- PyTorch nn.Linear layout
    bias:          (hidden_size,) or None
    gamma, beta:   (hidden_size,)              -- LayerNorm affine params
    On v6e (128 MiB VMEM) callers may pass block_m=1024 for fewer grid steps.
    """
    if avg_w is not None:
        # weight-perturbation path: linear(x, W - avg_w, b) -- plain JAX glue
        weight = weight - avg_w

    orig_shape = hidden_states.shape
    in_size = orig_shape[-1]
    hidden_size, w_in = weight.shape
    assert w_in == in_size, "weight/in_size mismatch"
    dtype = hidden_states.dtype

    x2d = hidden_states.reshape(-1, in_size)
    M = x2d.shape[0]

    # One-time transpose to (K, H): in-kernel dot contracts rhs dim 0, so the
    # loop-invariant weight never needs a per-step XLU transpose.
    w_t = jnp.transpose(weight)

    apply_norm = not not_norm
    add_bias = bool(use_bias) and (bias is not None)
    if bias is None:
        bias = jnp.zeros((hidden_size,), dtype=dtype)
    if gamma is None:
        gamma = jnp.ones((hidden_size,), dtype=dtype)
    if beta is None:
        beta = jnp.zeros((hidden_size,), dtype=dtype)
    b2d = bias.reshape(1, hidden_size)
    g2d = gamma.reshape(1, hidden_size)
    be2d = beta.reshape(1, hidden_size)

    x_bytes = jnp.dtype(dtype).itemsize
    w_bytes = jnp.dtype(weight.dtype).itemsize
    row_align = {4: 8, 2: 16, 1: 32}.get(x_bytes, 8)   # 16 for bf16, 32 for int8/fp8

    # ---- K tiling: only when the weight cannot stay resident in VMEM ----
    if block_k is None:
        block_k = in_size
        if (in_size * hidden_size * w_bytes > _WEIGHT_RESIDENT_BYTES
                and in_size % 128 == 0):
            for cand in (512, 384, 256, 128):
                if in_size % cand == 0:
                    block_k = cand
                    break
    block_k = min(block_k, in_size)
    if block_k != in_size and (in_size % block_k != 0 or block_k % 128 != 0):
        block_k = in_size          # ragged K would pollute the accumulator
    k_tiles = in_size // block_k
    multi_k = k_tiles > 1

    # ---- token-tile size from an explicit VMEM budget ----
    fixed = 2 * block_k * hidden_size * w_bytes        # weight (counted double-buffered)
    fixed += 3 * 2 * hidden_size * 4                   # bias / gamma / beta
    fixed += 2 * 1024 * 1024                           # compiler slack
    per_row = 2 * block_k * x_bytes                    # x tile, double-buffered
    per_row += 2 * hidden_size * x_bytes               # out tile, double-buffered
    per_row += 4 * hidden_size                         # f32 epilogue temporaries
    if multi_k:
        per_row += 4 * hidden_size                     # f32 accumulator scratch

    tm = _round_up(min(block_m, _round_up(M, row_align)), row_align)
    while tm > row_align and fixed + tm * per_row > vmem_budget_bytes:
        tm = _round_up(max(tm // 2, row_align), row_align)
    m_tiles = pl.cdiv(M, tm)                           # ragged last block: no jnp.pad
    vmem_limit = int(min(max(fixed + tm * per_row + (4 << 20),
                             32 * 1024 * 1024), 127 * 1024 * 1024))
    sub_m = min(tm, 256)                               # epilogue/MXU interleave chunk

    kernel = functools.partial(
        _bert_head_transform_kernel,
        eps=eps, skip_act=skip_act, approx_gelu=approx_gelu,
        add_bias=add_bias, apply_norm=apply_norm, sub_m=sub_m)

    grid = (m_tiles, k_tiles)
    scratch = [pltpu.VMEM((tm, hidden_size), jnp.float32)] if multi_k else []

    def _run(single_buffer_resident):
        def resident_spec(shape):
            if single_buffer_resident:
                return pl.BlockSpec(shape, lambda i, k: (0, 0),
                                    pipeline_mode=pl.Buffered(1))
            return pl.BlockSpec(shape, lambda i, k: (0, 0))

        if multi_k:
            # streamed weight tiles: keep default double-buffering
            w_spec = pl.BlockSpec((block_k, hidden_size), lambda i, k: (k, 0))
        else:
            w_spec = resident_spec((block_k, hidden_size))

        return pl.pallas_call(
            kernel,
            out_shape=jax.ShapeDtypeStruct((M, hidden_size), dtype),
            grid=grid,
            in_specs=[
                pl.BlockSpec((tm, block_k), lambda i, k: (i, k)),   # streamed x
                w_spec,
                resident_spec((1, hidden_size)),                    # bias
                resident_spec((1, hidden_size)),                    # gamma
                resident_spec((1, hidden_size)),                    # beta
            ],
            out_specs=pl.BlockSpec((tm, hidden_size), lambda i, k: (i, 0)),
            scratch_shapes=scratch,
            compiler_params=pltpu.CompilerParams(
                dimension_semantics=("parallel", "arbitrary"),
                vmem_limit_bytes=vmem_limit),
        )(x2d, w_t, b2d, g2d, be2d)

    try:
        out2d = _run(True)
    except Exception:
        # pl.Buffered(1) (single-buffered resident operands) unsupported on this
        # jax/Mosaic build -- fall back to default double buffering.
        out2d = _run(False)

    return out2d.reshape(*orig_shape[:-1], hidden_size)


def _reference(hidden_states, weight, bias, gamma, beta, eps=1e-12):
    h = jnp.einsum("...k,hk->...h", hidden_states, weight)
    if bias is not None:
        h = h + bias
    h = 0.5 * h * (1.0 + jax.lax.erf(h * 0.7071067811865476))
    mean = jnp.mean(h, axis=-1, keepdims=True)
    var = jnp.mean(jnp.square(h - mean), axis=-1, keepdims=True)
    h = (h - mean) / jnp.sqrt(var + eps)
    return h * gamma + beta


if __name__ == "__main__":
    key = jax.random.PRNGKey(0)
    ks = jax.random.split(key, 10)

    # --- Test 1: resident-weight path (single K block), BERT-head-like shapes ---
    batch, seq, hidden = 2, 8, 32
    x = jax.random.normal(ks[0], (batch, seq, hidden), dtype=jnp.float32)
    weight = jax.random.normal(ks[1], (hidden, hidden), dtype=jnp.float32) * 0.02
    bias = jax.random.normal(ks[2], (hidden,), dtype=jnp.float32) * 0.02
    gamma = 1.0 + 0.1 * jax.random.normal(ks[3], (hidden,), dtype=jnp.float32)
    beta = 0.1 * jax.random.normal(ks[4], (hidden,), dtype=jnp.float32)

    out = bert_head_transform(x, weight, bias, gamma, beta, eps=1e-12)
    out = jax.block_until_ready(out)
    ref = _reference(x, weight, bias, gamma, beta, eps=1e-12)
    assert out.shape == (batch, seq, hidden)
    # loose tolerance: TPU default-precision MXU passes for f32
    assert jnp.allclose(out, ref, atol=1e-2, rtol=1e-2), "mismatch (resident path)"

    # --- Test 2: K-tiled reduction path (forced small block_k) ---
    in2, hid2 = 256, 128
    x2 = jax.random.normal(ks[5], (batch, seq, in2), dtype=jnp.float32)
    w2 = jax.random.normal(ks[6], (hid2, in2), dtype=jnp.float32) * 0.02
    b2 = jax.random.normal(ks[7], (hid2,), dtype=jnp.float32) * 0.02
    g2 = 1.0 + 0.1 * jax.random.normal(ks[8], (hid2,), dtype=jnp.float32)
    be2 = 0.1 * jax.random.normal(ks[9], (hid2,), dtype=jnp.float32)

    out2 = bert_head_transform(x2, w2, b2, g2, be2, eps=1e-12, block_k=128)
    out2 = jax.block_until_ready(out2)
    ref2 = _reference(x2, w2, b2, g2, be2, eps=1e-12)
    assert out2.shape == (batch, seq, hid2)
    assert jnp.allclose(out2, ref2, atol=1e-2, rtol=1e-2), "mismatch (K-tiled path)"

    print("KERNEL_OK")
</pallas_src>

<mosaic_0001>
module attributes {stable_mosaic.version = 11 : i64} {
  func.func @_bert_head_transform_kernel(%arg0: i32, %arg1: i32, %arg2: memref<16x32xf32, #tpu.memory_space<vmem>>, %arg3: memref<32x32xf32, #tpu.memory_space<vmem>>, %arg4: memref<1x32xf32, #tpu.memory_space<vmem>>, %arg5: memref<1x32xf32, #tpu.memory_space<vmem>>, %arg6: memref<1x32xf32, #tpu.memory_space<vmem>>, %arg7: memref<16x32xf32, #tpu.memory_space<vmem>>) attributes {dimension_semantics = [#tpu.dimension_semantics<parallel>, #tpu.dimension_semantics<arbitrary>], iteration_bounds = array<i64: 1, 1>, scalar_prefetch = 0 : i64, scratch_operands = 0 : i64, tpu.core_type = #tpu.core_type<tc>, window_params = [{transform_indices = @transform_0, window_bounds = array<i64: 16, 32>}, {pipeline_mode = #tpu.pipeline_mode<synchronous>, transform_indices = @transform_1, window_bounds = array<i64: 32, 32>}, {pipeline_mode = #tpu.pipeline_mode<synchronous>, transform_indices = @transform_2, window_bounds = array<i64: 1, 32>}, {pipeline_mode = #tpu.pipeline_mode<synchronous>, transform_indices = @transform_3, window_bounds = array<i64: 1, 32>}, {pipeline_mode = #tpu.pipeline_mode<synchronous>, transform_indices = @transform_4, window_bounds = array<i64: 1, 32>}, {transform_indices = @transform_5, window_bounds = array<i64: 16, 32>}]} {
    %c0 = arith.constant 0 : index
    %c0_0 = arith.constant 0 : index
    %0 = vector.load %arg3[%c0, %c0_0] : memref<32x32xf32, #tpu.memory_space<vmem>>, vector<32x32xf32>
    %c0_1 = arith.constant 0 : index
    %c0_2 = arith.constant 0 : index
    %1 = vector.load %arg4[%c0_1, %c0_2] : memref<1x32xf32, #tpu.memory_space<vmem>>, vector<1x32xf32>
    %c0_3 = arith.constant 0 : index
    %c0_4 = arith.constant 0 : index
    %2 = vector.load %arg5[%c0_3, %c0_4] : memref<1x32xf32, #tpu.memory_space<vmem>>, vector<1x32xf32>
    %c0_5 = arith.constant 0 : index
    %c0_6 = arith.constant 0 : index
    %3 = vector.load %arg6[%c0_5, %c0_6] : memref<1x32xf32, #tpu.memory_space<vmem>>, vector<1x32xf32>
    %c0_7 = arith.constant 0 : index
    %c0_8 = arith.constant 0 : index
    %4 = vector.load %arg2[%c0_7, %c0_8] : memref<16x32xf32, #tpu.memory_space<vmem>>, vector<16x32xf32>
    %cst = arith.constant dense<0.000000e+00> : vector<16x32xf32>
    %5 = tpu.matmul %4, %0, %cst {dimension_numbers = #tpu.dot_dimension_numbers<[1], [0], [0], [1], [0, 0, 1, 1], [], []>} : vector<16x32xf32>, vector<32x32xf32>, vector<16x32xf32> -> vector<16x32xf32>
    %6 = vector.broadcast %1 : vector<1x32xf32> to vector<16x32xf32>
    %7 = arith.addf %5, %6 : vector<16x32xf32>
    %cst_9 = arith.constant 5.000000e-01 : f32
    %8 = vector.broadcast %cst_9 : f32 to vector<16x32xf32>
    %9 = arith.mulf %8, %7 : vector<16x32xf32>
    %cst_10 = arith.constant 0.707106769 : f32
    %10 = vector.broadcast %cst_10 : f32 to vector<16x32xf32>
    %11 = arith.mulf %7, %10 : vector<16x32xf32>
    %12 = math.erf %11 : vector<16x32xf32>
    %cst_11 = arith.constant 1.000000e+00 : f32
    %13 = vector.broadcast %cst_11 : f32 to vector<16x32xf32>
    %14 = arith.addf %13, %12 : vector<16x32xf32>
    %15 = arith.mulf %9, %14 : vector<16x32xf32>
    %cst_12 = arith.constant dense<0.000000e+00> : vector<16xf32>
    %16 = vector.multi_reduction <add>, %15, %cst_12 [1] : vector<16x32xf32> to vector<16xf32>
    %17 = vector.shape_cast %16 : vector<16xf32> to vector<16x1xf32>
    %cst_13 = arith.constant 3.200000e+01 : f32
    %18 = vector.broadcast %cst_13 : f32 to vector<16x1xf32>
    %19 = arith.divf %17, %18 : vector<16x1xf32>
    %20 = vector.broadcast %19 : vector<16x1xf32> to vector<16x32xf32>
    %21 = arith.subf %15, %20 : vector<16x32xf32>
    %22 = arith.mulf %21, %21 : vector<16x32xf32>
    %cst_14 = arith.constant dense<0.000000e+00> : vector<16xf32>
    %23 = vector.multi_reduction <add>, %22, %cst_14 [1] : vector<16x32xf32> to vector<16xf32>
    %24 = vector.shape_cast %23 : vector<16xf32> to vector<16x1xf32>
    %cst_15 = arith.constant 3.200000e+01 : f32
    %25 = vector.broadcast %cst_15 : f32 to vector<16x1xf32>
    %26 = arith.divf %24, %25 : vector<16x1xf32>
    %27 = vector.broadcast %19 : vector<16x1xf32> to vector<16x32xf32>
    %28 = arith.subf %15, %27 : vector<16x32xf32>
    %cst_16 = arith.constant 9.99999996E-13 : f32
    %29 = vector.broadcast %cst_16 : f32 to vector<16x1xf32>
    %30 = arith.addf %26, %29 : vector<16x1xf32>
    %31 = math.rsqrt %30 : vector<16x1xf32>
    %32 = vector.broadcast %31 : vector<16x1xf32> to vector<16x32xf32>
    %33 = arith.mulf %28, %32 : vector<16x32xf32>
    %34 = vector.broadcast %2 : vector<1x32xf32> to vector<16x32xf32>
    %35 = arith.mulf %33, %34 : vector<16x32xf32>
    %36 = vector.broadcast %3 : vector<1x32xf32> to vector<16x32xf32>
    %37 = arith.addf %35, %36 : vector<16x32xf32>
    %c0_17 = arith.constant 0 : index
    %c0_18 = arith.constant 0 : index
    %38 = vector.load %arg7[%c0_17, %c0_18] : memref<16x32xf32, #tpu.memory_space<vmem>>, vector<16x32xf32>
    tpu.vector_store %arg7[%c0_17, %c0_18], %37 {strides = array<i32>} : memref<16x32xf32, #tpu.memory_space<vmem>>, vector<16x32xf32>,
    return
  }
  func.func @transform_0(%arg0: i32, %arg1: i32) -> (i32, i32) {
    %c0_i32 = arith.constant 0 : i32
    return %arg0, %arg1 : i32, i32
  }
  func.func @transform_1(%arg0: i32, %arg1: i32) -> (i32, i32) {
    %c0_i32 = arith.constant 0 : i32
    %c0_i32_0 = arith.constant 0 : i32
    %c0_i32_1 = arith.constant 0 : i32
    return %c0_i32, %c0_i32_0 : i32, i32
  }
  func.func @transform_2(%arg0: i32, %arg1: i32) -> (i32, i32) {
    %c0_i32 = arith.constant 0 : i32
    %c0_i32_0 = arith.constant 0 : i32
    %c0_i32_1 = arith.constant 0 : i32
    return %c0_i32, %c0_i32_0 : i32, i32
  }
  func.func @transform_3(%arg0: i32, %arg1: i32) -> (i32, i32) {
    %c0_i32 = arith.constant 0 : i32
    %c0_i32_0 = arith.constant 0 : i32
    %c0_i32_1 = arith.constant 0 : i32
    return %c0_i32, %c0_i32_0 : i32, i32
  }
  func.func @transform_4(%arg0: i32, %arg1: i32) -> (i32, i32) {
    %c0_i32 = arith.constant 0 : i32
    %c0_i32_0 = arith.constant 0 : i32
    %c0_i32_1 = arith.constant 0 : i32
    return %c0_i32, %c0_i32_0 : i32, i32
  }
  func.func @transform_5(%arg0: i32, %arg1: i32) -> (i32, i32) {
    %c0_i32 = arith.constant 0 : i32
    %c0_i32_0 = arith.constant 0 : i32
    return %arg0, %c0_i32 : i32, i32
  }
}

module attributes {stable_mosaic.version = 11 : i64} {
  func.func @_bert_head_transform_kernel(%arg0: i32, %arg1: i32, %arg2: memref<16x32xf32, #tpu.memory_space<vmem>>, %arg3: memref<32x32xf32, #tpu.memory_space<vmem>>, %arg4: memref<1x32xf32, #tpu.memory_space<vmem>>, %arg5: memref<1x32xf32, #tpu.memory_space<vmem>>, %arg6: memref<1x32xf32, #tpu.memory_space<vmem>>, %arg7: memref<16x32xf32, #tpu.memory_space<vmem>>) attributes {dimension_semantics = [#tpu.dimension_semantics<parallel>, #tpu.dimension_semantics<arbitrary>], iteration_bounds = array<i64: 1, 1>, scalar_prefetch = 0 : i64, scratch_operands = 0 : i64, tpu.core_type = #tpu.core_type<tc>, window_params = [{transform_indices = @transform_0, window_bounds = array<i64: 16, 32>}, {pipeline_mode = #tpu.pipeline_mode<synchronous>, transform_indices = @transform_1, window_bounds = array<i64: 32, 32>}, {pipeline_mode = #tpu.pipeline_mode<synchronous>, transform_indices = @transform_2, window_bounds = array<i64: 1, 32>}, {pipeline_mode = #tpu.pipeline_mode<synchronous>, transform_indices = @transform_3, window_bounds = array<i64: 1, 32>}, {pipeline_mode = #tpu.pipeline_mode<synchronous>, transform_indices = @transform_4, window_bounds = array<i64: 1, 32>}, {transform_indices = @transform_5, window_bounds = array<i64: 16, 32>}]} {
    %c0 = arith.constant 0 : index
    %c0_0 = arith.constant 0 : index
    %0 = vector.load %arg3[%c0, %c0_0] : memref<32x32xf32, #tpu.memory_space<vmem>>, vector<32x32xf32>
    %c0_1 = arith.constant 0 : index
    %c0_2 = arith.constant 0 : index
    %1 = vector.load %arg4[%c0_1, %c0_2] : memref<1x32xf32, #tpu.memory_space<vmem>>, vector<1x32xf32>
    %c0_3 = arith.constant 0 : index
    %c0_4 = arith.constant 0 : index
    %2 = vector.load %arg5[%c0_3, %c0_4] : memref<1x32xf32, #tpu.memory_space<vmem>>, vector<1x32xf32>
    %c0_5 = arith.constant 0 : index
    %c0_6 = arith.constant 0 : index
    %3 = vector.load %arg6[%c0_5, %c0_6] : memref<1x32xf32, #tpu.memory_space<vmem>>, vector<1x32xf32>
    %c0_7 = arith.constant 0 : index
    %c0_8 = arith.constant 0 : index
    %4 = vector.load %arg2[%c0_7, %c0_8] : memref<16x32xf32, #tpu.memory_space<vmem>>, vector<16x32xf32>
    %cst = arith.constant dense<0.000000e+00> : vector<16x32xf32>
    %5 = tpu.matmul %4, %0, %cst {dimension_numbers = #tpu.dot_dimension_numbers<[1], [0], [0], [1], [0, 0, 1, 1], [], []>} : vector<16x32xf32>, vector<32x32xf32>, vector<16x32xf32> -> vector<16x32xf32>
    %6 = vector.broadcast %1 : vector<1x32xf32> to vector<16x32xf32>
    %7 = arith.addf %5, %6 : vector<16x32xf32>
    %cst_9 = arith.constant 5.000000e-01 : f32
    %8 = vector.broadcast %cst_9 : f32 to vector<16x32xf32>
    %9 = arith.mulf %8, %7 : vector<16x32xf32>
    %cst_10 = arith.constant 0.707106769 : f32
    %10 = vector.broadcast %cst_10 : f32 to vector<16x32xf32>
    %11 = arith.mulf %7, %10 : vector<16x32xf32>
    %12 = math.erf %11 : vector<16x32xf32>
    %cst_11 = arith.constant 1.000000e+00 : f32
    %13 = vector.broadcast %cst_11 : f32 to vector<16x32xf32>
    %14 = arith.addf %13, %12 : vector<16x32xf32>
    %15 = arith.mulf %9, %14 : vector<16x32xf32>
    %cst_12 = arith.constant dense<0.000000e+00> : vector<16xf32>
    %16 = vector.multi_reduction <add>, %15, %cst_12 [1] : vector<16x32xf32> to vector<16xf32>
    %17 = vector.shape_cast %16 : vector<16xf32> to vector<16x1xf32>
    %cst_13 = arith.constant 3.200000e+01 : f32
    %18 = vector.broadcast %cst_13 : f32 to vector<16x1xf32>
    %19 = arith.divf %17, %18 : vector<16x1xf32>
    %20 = vector.broadcast %19 : vector<16x1xf32> to vector<16x32xf32>
    %21 = arith.subf %15, %20 : vector<16x32xf32>
    %22 = arith.mulf %21, %21 : vector<16x32xf32>
    %cst_14 = arith.constant dense<0.000000e+00> : vector<16xf32>
    %23 = vector.multi_reduction <add>, %22, %cst_14 [1] : vector<16x32xf32> to vector<16xf32>
    %24 = vector.shape_cast %23 : vector<16xf32> to vector<16x1xf32>
    %cst_15 = arith.constant 3.200000e+01 : f32
    %25 = vector.broadcast %cst_15 : f32 to vector<16x1xf32>
    %26 = arith.divf %24, %25 : vector<16x1xf32>
    %27 = vector.broadcast %19 : vector<16x1xf32> to vector<16x32xf32>
    %28 = arith.subf %15, %27 : vector<16x32xf32>
    %cst_16 = arith.constant 9.99999996E-13 : f32
    %29 = vector.broadcast %cst_16 : f32 to vector<16x1xf32>
    %30 = arith.addf %26, %29 : vector<16x1xf32>
    %31 = math.rsqrt %30 : vector<16x1xf32>
    %32 = vector.broadcast %31 : vector<16x1xf32> to vector<16x32xf32>
    %33 = arith.mulf %28, %32 : vector<16x32xf32>
    %34 = vector.broadcast %2 : vector<1x32xf32> to vector<16x32xf32>
    %35 = arith.mulf %33, %34 : vector<16x32xf32>
    %36 = vector.broadcast %3 : vector<1x32xf32> to vector<16x32xf32>
    %37 = arith.addf %35, %36 : vector<16x32xf32>
    %c0_17 = arith.constant 0 : index
    %c0_18 = arith.constant 0 : index
    %38 = vector.load %arg7[%c0_17, %c0_18] : memref<16x32xf32, #tpu.memory_space<vmem>>, vector<16x32xf32>
    tpu.vector_store %arg7[%c0_17, %c0_18], %37 {strides = array<i32>} : memref<16x32xf32, #tpu.memory_space<vmem>>, vector<16x32xf32>,
    return
  }
  func.func @transform_0(%arg0: i32, %arg1: i32) -> (i32, i32) {
    %c0_i32 = arith.constant 0 : i32
    return %arg0, %arg1 : i32, i32
  }
  func.func @transform_1(%arg0: i32, %arg1: i32) -> (i32, i32) {
    %c0_i32 = arith.constant 0 : i32
    %c0_i32_0 = arith.constant 0 : i32
    %c0_i32_1 = arith.constant 0 : i32
    return %c0_i32, %c0_i32_0 : i32, i32
  }
  func.func @transform_2(%arg0: i32, %arg1: i32) -> (i32, i32) {
    %c0_i32 = arith.constant 0 : i32
    %c0_i32_0 = arith.constant 0 : i32
    %c0_i32_1 = arith.constant 0 : i32
    return %c0_i32, %c0_i32_0 : i32, i32
  }
  func.func @transform_3(%arg0: i32, %arg1: i32) -> (i32, i32) {
    %c0_i32 = arith.constant 0 : i32
    %c0_i32_0 = arith.constant 0 : i32
    %c0_i32_1 = arith.constant 0 : i32
    return %c0_i32, %c0_i32_0 : i32, i32
  }
  func.func @transform_4(%arg0: i32, %arg1: i32) -> (i32, i32) {
    %c0_i32 = arith.constant 0 : i32
    %c0_i32_0 = arith.constant 0 : i32
    %c0_i32_1 = arith.constant 0 : i32
    return %c0_i32, %c0_i32_0 : i32, i32
  }
  func.func @transform_5(%arg0: i32, %arg1: i32) -> (i32, i32) {
    %c0_i32 = arith.constant 0 : i32
    %c0_i32_0 = arith.constant 0 : i32
    return %arg0, %c0_i32 : i32, i32
  }
}

</mosaic_0001>

<bundles_post_ra>
// kernel: tpu_custom_call.1
= control target key start
LH: loop header
LB: loop body
LE: loop exit
PB: predicated region body
PF: predicated region fallthrough
CT: control target
= control target key end

     0   :  { %10 = vsyncpa [#allocation3], 0  ;;  %s390_s0 = inlined_call_operand.hbm [shape: f32[16,32], index: 0, kind: input, shape index: {}]   ;;  %s391_s1 = inlined_call_operand.hbm [shape: f32[32,32], index: 1, kind: input, shape index: {}]   ;;  %s392_s2 = inlined_call_operand.vmem [shape: f32[1,32], index: 2, kind: input, shape index: {}]   ;;  %s393_s3 = inlined_call_operand.vmem [shape: f32[1,32], index: 3, kind: input, shape index: {}]   ;;  %s394_s4 = inlined_call_operand.vmem [shape: f32[1,32], index: 4, kind: input, shape index: {}]   ;;  %s395_s5 = inlined_call_operand.hbm [shape: f32[16,32], index: 5, kind: output, shape index: {}]  }
   0x1   :  { %11 = vsyncpa [#allocation6], 0 }
   0x2   :  { %12 = vsyncpa [#allocation4], 0  ;;  %s320_s18 = smov [#allocation2]  }
   0x3   :  { %s18_s19 = sshll.u32 %s320_s18, 4  ;;  %s19_s19 = int_to_ptr.vmem [resolvable:$true] %s18_s19 }
   0x4   :  { %s262_s20 = scalar_lea.vmem %s19_s19, 256  ;;  %p267_p1 = scmp.lt.s32.totalorder %s19_s19, %s19_s19 }
   0x5   :  { %p263_p0 = scmp.ne.s32.totalorder %s19_s19, %s262_s20  ;;  %p268_p2 = scmp.lt.s32.totalorder %s262_s20, %s262_s20 }
   0x7   :  { %p269_p3 = por %p268_p2, %p267_p1 }
   0x9   :  { %p270_p4 = pnand %p269_p3, %p263_p0 }
   0xb   :  { %273 = shalt.err (!%p270_p4)
}
   0xc   :  { %s321_s21 = smov 128   ;;  %s322_s22 = smov 8  }
   0xd   :  { %24 = dma.hbm_to_vmem [thread:$0]  %s390_s0, 256, %s19_s19, [#allocation3], %s321_s21, %s321_s21, %s322_s22  }
   0xe   :  { %s323_s25 = smov [#allocation5]  }
   0xf   :  { %s30_s26 = sshll.u32 %s323_s25, 4  ;;  %s31_s26 = int_to_ptr.vmem [resolvable:$true] %s30_s26 }
  0x10   :  { %s282_s27 = scalar_lea.vmem %s31_s26, 512  ;;  %p287_p6 = scmp.lt.s32.totalorder %s31_s26, %s31_s26 }
  0x11   :  { %p283_p5 = scmp.ne.s32.totalorder %s31_s26, %s282_s27  ;;  %p288_p7 = scmp.lt.s32.totalorder %s282_s27, %s282_s27 }
  0x13   :  { %p289_p8 = por %p288_p7, %p287_p6 }
  0x15   :  { %p290_p9 = pnand %p289_p8, %p283_p5 }
  0x17   :  { %293 = shalt.err (!%p290_p9)
}
  0x18   :  { %36 = dma.hbm_to_vmem [thread:$0]  %s391_s1, 512, %s31_s26, [#allocation6], %s321_s21, %s321_s21, %s322_s22  }
  0x19   :  { %314 = dma.done.wait [#allocation3], 256  }
  0x1a   :  { %315 = vsyncadd [#allocation3], 4294967040 }
  0x1b   :  { %316 = dma.done.wait [#allocation6], 512  }
  0x1c   :  { %317 = vsyncadd [#allocation6], 4294966784  ;;  %vm64_vm0 = vcmask 261120   ;;  %v52_v0 = vld [vmem:[#allocation5 + $0x18] sm:$0xff]  ;;  %v51_v1 = vld [vmem:[#allocation5 + $0x10] sm:$0xff]  ;;  %s324_s8 = smov [#allocation7]  }
  0x1d   :  { %230 = vmatprep.subr.mxu0 %v52_v0  ;;  %v56_v2 = vld [vmem:[#allocation2] sm:$0xff]  ;;  %v50_v3 = vld [vmem:[#allocation5 + $0x8] sm:$0xff]  ;;  %v49_v4 = vld [vmem:[#allocation5] sm:$0xff]  ;;  %s206_s9 = sshll.u32 %s324_s8, 4  ;;  %s207_s9 = int_to_ptr.vmem [resolvable:$true] %s206_s9 }
  0x1e   :  { %231 = vmatpush3.msra.mxu0 %v52_v0  ;;  %238 = vmatprep.mubr.msk.f32.mxu0 %vm64_vm0, %v56_v2  ;;  %v57_v5 = vld [vmem:[#allocation2 + $0x8] sm:$0xff]  ;;  %v219_v6 = vld [vmem:[%s392_s2] ss:$0 sm:$0xff]  ;;  %s294_s10 = scalar_lea.vmem %s207_s9, 256  ;;  %p299_p11 = scmp.lt.s32.totalorder %s207_s9, %s207_s9 }
  0x1f   :  { %232 = vmatprep.subr.mxu0 %v51_v1  ;;  %v222_v40 = vld [vmem:[%s393_s3] ss:$0 sm:$0xff]  ;;  %p295_p10 = scmp.ne.s32.totalorder %s207_s9, %s294_s10  ;;  %p300_p12 = scmp.lt.s32.totalorder %s294_s10, %s294_s10 }
  0x20   :  { %233 = vmatpush3.msra.mxu0 %v51_v1  ;;  %v223_v42 = vld [vmem:[%s394_s4] ss:$0 sm:$0xff] }
  0x21   :  { %234 = vmatprep.subr.mxu0 %v50_v3  ;;  %p301_p13 = por %p300_p12, %p299_p11 }
  0x22   :  { %235 = vmatpush3.msra.mxu0 %v50_v3 }
  0x23   :  { %236 = vmatprep.subr.mxu0 %v49_v4  ;;  %p302_p0 = pnand %p301_p13, %p295_p10 }
  0x24   :  { %237 = vmatpush3.msra.mxu0 %v49_v4 }
  0x25   :  { %239 = vmatmul.mubr.msk.f32.vlgmr.msra.gmra.mxu0 %vm64_vm0, %v57_v5 }
  0xe5   :  { %v240_v7 = vpop.f32.mrf.mxu0 }
  0xe6   :  { %v143_v8 = vadd.f32 %v240_v7, %v219_v6 }
  0xe7   :  { %v137_v9 = vpop.f32.mrf.mxu0 }
  0xe8   :  { %v149_v10 = vmul.f32 0.70710677, %v143_v8  ;;  %v138_v11 = vadd.f32 %v219_v6, %v137_v9  ;;  %v147_v18 = vmul.f32 0.5, %v143_v8 }
  0xea   :  { %246 = verf.f32 %v149_v10  ;;  %v148_v12 = vmul.f32 0.70710677, %v138_v11  ;;  %v146_v15 = vmul.f32 0.5, %v138_v11 }
  0xec   :  { %248 = verf.f32 %v148_v12 }
  0xf7   :  { %v247_v13 = vpop.eup %246 }
  0xf8   :  { %v153_v17 = vadd.f32 1.0, %v247_v13 }
  0xf9   :  { %v249_v14 = vpop.eup %248 }
  0xfa   :  { %v152_v16 = vadd.f32 1.0, %v249_v14  ;;  %v155_v21 = vmul.f32 %v153_v17, %v147_v18 }
  0xfc   :  { %v154_v19 = vmul.f32 %v152_v16, %v146_v15  ;;  %v159_v22 = vsel %vm64_vm0, %v155_v21, 0.0 }
  0xfe   :  { %v156_v20 = vsel %vm64_vm0, %v154_v19, 0.0 }
  0xff   :  { %157 = vadd.xlane.f32.xlu0 %v156_v20 }
 0x103   :  { %160 = vadd.xlane.f32.xlu0 %v159_v22 }
 0x188   :  { %v158_v23 = vpop.xlane.xlu0 %157 }
 0x189   :  { %v163_v24 = vmul.f32 0.03125, %v158_v23 }
 0x18b   :  { %v165_v25 = vsub.f32 %v154_v19, %v163_v24 }
 0x18c   :  { %v161_v26 = vpop.xlane.xlu0 %160 }
 0x18d   :  { %v164_v27 = vmul.f32 0.03125, %v161_v26  ;;  %v167_v28 = vmul.f32 %v165_v25, %v165_v25 }
 0x18f   :  { %v166_v29 = vsub.f32 %v155_v21, %v164_v27  ;;  %v169_v30 = vsel %vm64_vm0, %v167_v28, 0.0 }
 0x190   :  { %170 = vadd.xlane.f32.xlu1 %v169_v30 }
 0x191   :  { %v168_v31 = vmul.f32 %v166_v29, %v166_v29 }
 0x193   :  { %v172_v32 = vsel %vm64_vm0, %v168_v31, 0.0 }
 0x194   :  { %173 = vadd.xlane.f32.xlu1 %v172_v32 }
 0x219   :  { %v171_v33 = vpop.xlane.xlu1 %170 }
 0x21a   :  { %v175_v34 = vmul.f32 0.03125, %v171_v33 }
 0x21c   :  { %v177_v35 = vadd.f32 1e-12, %v175_v34 }
 0x21d   :  { %v174_v36 = vpop.xlane.xlu1 %173 }
 0x21e   :  { %250 = vrsqrt.f32 %v177_v35  ;;  %v176_v37 = vmul.f32 0.03125, %v174_v36 }
 0x220   :  { %v178_v38 = vadd.f32 1e-12, %v176_v37 }
 0x222   :  { %252 = vrsqrt.f32 %v178_v38 }
 0x22b   :  { %v251_v39 = vpop.eup %250 }
 0x22c   :  { %v181_v41 = vmul.f32 %v251_v39, %v165_v25 }
 0x22e   :  { %v189_v43 = vmul.f32 %v222_v40, %v181_v41 }
 0x22f   :  { %v253_v44 = vpop.eup %252 }
 0x230   :  { %v182_v45 = vmul.f32 %v253_v44, %v166_v29  ;;  %v197_v46 = vadd.f32 %v223_v42, %v189_v43 }
 0x232   :  { %v190_v47 = vmul.f32 %v222_v40, %v182_v45  ;;  %199 = vst.msk [vmem:[#allocation7] sm:$0xff] %vm64_vm0, %v197_v46 }
 0x234   :  { %v198_v48 = vadd.f32 %v223_v42, %v190_v47 }
 0x236   :  { %200 = vst.msk [vmem:[#allocation7 + $0x8] sm:$0xff] %vm64_vm0, %v198_v48 }
 0x237   :  { %305 = shalt.err (!%p302_p0)
}
 0x238   :  { %212 = dma.vmem_to_hbm [thread:$0]  %s207_s9, 256, %s395_s5, [#allocation4], %s321_s21, %s321_s21, %s322_s22  }
 0x239   :  { %318 = dma.done.wait [#allocation4], 256  }
 0x23a   :  { %319 = vsyncadd [#allocation4], 4294967040 }
 0x23b   :  { %216 = vsyncpa [#allocation3], 1 }
 0x23c   :  { %217 = vsyncpa [#allocation6], 1 }
 0x23d   :  { %218 = vsyncpa [#allocation4], 1 }

// kernel: tpu_custom_call.1
= control target key start
LH: loop header
LB: loop body
LE: loop exit
PB: predicated region body
PF: predicated region fallthrough
CT: control target
= control target key end

     0   :  { %10 = vsyncpa [#allocation3], 0  ;;  %s390_s0 = inlined_call_operand.hbm [shape: f32[16,32], index: 0, kind: input, shape index: {}]   ;;  %s391_s1 = inlined_call_operand.hbm [shape: f32[32,32], index: 1, kind: input, shape index: {}]   ;;  %s392_s2 = inlined_call_operand.vmem [shape: f32[1,32], index: 2, kind: input, shape index: {}]   ;;  %s393_s3 = inlined_call_operand.vmem [shape: f32[1,32], index: 3, kind: input, shape index: {}]   ;;  %s394_s4 = inlined_call_operand.vmem [shape: f32[1,32], index: 4, kind: input, shape index: {}]   ;;  %s395_s5 = inlined_call_operand.hbm [shape: f32[16,32], index: 5, kind: output, shape index: {}]  }
   0x1   :  { %11 = vsyncpa [#allocation6], 0 }
   0x2   :  { %12 = vsyncpa [#allocation4], 0  ;;  %s320_s18 = smov [#allocation2]  }
   0x3   :  { %s18_s19 = sshll.u32 %s320_s18, 4  ;;  %s19_s19 = int_to_ptr.vmem [resolvable:$true] %s18_s19 }
   0x4   :  { %s262_s20 = scalar_lea.vmem %s19_s19, 256  ;;  %p267_p1 = scmp.lt.s32.totalorder %s19_s19, %s19_s19 }
   0x5   :  { %p263_p0 = scmp.ne.s32.totalorder %s19_s19, %s262_s20  ;;  %p268_p2 = scmp.lt.s32.totalorder %s262_s20, %s262_s20 }
   0x7   :  { %p269_p3 = por %p268_p2, %p267_p1 }
   0x9   :  { %p270_p4 = pnand %p269_p3, %p263_p0 }
   0xb   :  { %273 = shalt.err (!%p270_p4)
}
   0xc   :  { %s321_s21 = smov 128   ;;  %s322_s22 = smov 8  }
   0xd   :  { %24 = dma.hbm_to_vmem [thread:$0]  %s390_s0, 256, %s19_s19, [#allocation3], %s321_s21, %s321_s21, %s322_s22  }
   0xe   :  { %s323_s25 = smov [#allocation5]  }
   0xf   :  { %s30_s26 = sshll.u32 %s323_s25, 4  ;;  %s31_s26 = int_to_ptr.vmem [resolvable:$true] %s30_s26 }
  0x10   :  { %s282_s27 = scalar_lea.vmem %s31_s26, 512  ;;  %p287_p6 = scmp.lt.s32.totalorder %s31_s26, %s31_s26 }
  0x11   :  { %p283_p5 = scmp.ne.s32.totalorder %s31_s26, %s282_s27  ;;  %p288_p7 = scmp.lt.s32.totalorder %s282_s27, %s282_s27 }
  0x13   :  { %p289_p8 = por %p288_p7, %p287_p6 }
  0x15   :  { %p290_p9 = pnand %p289_p8, %p283_p5 }
  0x17   :  { %293 = shalt.err (!%p290_p9)
}
  0x18   :  { %36 = dma.hbm_to_vmem [thread:$0]  %s391_s1, 512, %s31_s26, [#allocation6], %s321_s21, %s321_s21, %s322_s22  }
  0x19   :  { %314 = dma.done.wait [#allocation3], 256  }
  0x1a   :  { %315 = vsyncadd [#allocation3], 4294967040 }
  0x1b   :  { %316 = dma.done.wait [#allocation6], 512  }
  0x1c   :  { %317 = vsyncadd [#allocation6], 4294966784  ;;  %vm64_vm0 = vcmask 261120   ;;  %v52_v0 = vld [vmem:[#allocation5 + $0x18] sm:$0xff]  ;;  %v51_v1 = vld [vmem:[#allocation5 + $0x10] sm:$0xff]  ;;  %s324_s8 = smov [#allocation7]  }
  0x1d   :  { %230 = vmatprep.subr.mxu0 %v52_v0  ;;  %v56_v2 = vld [vmem:[#allocation2] sm:$0xff]  ;;  %v50_v3 = vld [vmem:[#allocation5 + $0x8] sm:$0xff]  ;;  %v49_v4 = vld [vmem:[#allocation5] sm:$0xff]  ;;  %s206_s9 = sshll.u32 %s324_s8, 4  ;;  %s207_s9 = int_to_ptr.vmem [resolvable:$true] %s206_s9 }
  0x1e   :  { %231 = vmatpush3.msra.mxu0 %v52_v0  ;;  %238 = vmatprep.mubr.msk.f32.mxu0 %vm64_vm0, %v56_v2  ;;  %v57_v5 = vld [vmem:[#allocation2 + $0x8] sm:$0xff]  ;;  %v219_v6 = vld [vmem:[%s392_s2] ss:$0 sm:$0xff]  ;;  %s294_s10 = scalar_lea.vmem %s207_s9, 256  ;;  %p299_p11 = scmp.lt.s32.totalorder %s207_s9, %s207_s9 }
  0x1f   :  { %232 = vmatprep.subr.mxu0 %v51_v1  ;;  %v222_v40 = vld [vmem:[%s393_s3] ss:$0 sm:$0xff]  ;;  %p295_p10 = scmp.ne.s32.totalorder %s207_s9, %s294_s10  ;;  %p300_p12 = scmp.lt.s32.totalorder %s294_s10, %s294_s10 }
  0x20   :  { %233 = vmatpush3.msra.mxu0 %v51_v1  ;;  %v223_v42 = vld [vmem:[%s394_s4] ss:$0 sm:$0xff] }
  0x21   :  { %234 = vmatprep.subr.mxu0 %v50_v3  ;;  %p301_p13 = por %p300_p12, %p299_p11 }
  0x22   :  { %235 = vmatpush3.msra.mxu0 %v50_v3 }
  0x23   :  { %236 = vmatprep.subr.mxu0 %v49_v4  ;;  %p302_p0 = pnand %p301_p13, %p295_p10 }
  0x24   :  { %237 = vmatpush3.msra.mxu0 %v49_v4 }
  0x25   :  { %239 = vmatmul.mubr.msk.f32.vlgmr.msra.gmra.mxu0 %vm64_vm0, %v57_v5 }
  0xe5   :  { %v240_v7 = vpop.f32.mrf.mxu0 }
  0xe6   :  { %v143_v8 = vadd.f32 %v240_v7, %v219_v6 }
  0xe7   :  { %v137_v9 = vpop.f32.mrf.mxu0 }
  0xe8   :  { %v149_v10 = vmul.f32 0.70710677, %v143_v8  ;;  %v138_v11 = vadd.f32 %v219_v6, %v137_v9  ;;  %v147_v18 = vmul.f32 0.5, %v143_v8 }
  0xea   :  { %246 = verf.f32 %v149_v10  ;;  %v148_v12 = vmul.f32 0.70710677, %v138_v11  ;;  %v146_v15 = vmul.f32 0.5, %v138_v11 }
  0xec   :  { %248 = verf.f32 %v148_v12 }
  0xf7   :  { %v247_v13 = vpop.eup %246 }
  0xf8   :  { %v153_v17 = vadd.f32 1.0, %v247_v13 }
  0xf9   :  { %v249_v14 = vpop.eup %248 }
  0xfa   :  { %v152_v16 = vadd.f32 1.0, %v249_v14  ;;  %v155_v21 = vmul.f32 %v153_v17, %v147_v18 }
  0xfc   :  { %v154_v19 = vmul.f32 %v152_v16, %v146_v15  ;;  %v159_v22 = vsel %vm64_vm0, %v155_v21, 0.0 }
  0xfe   :  { %v156_v20 = vsel %vm64_vm0, %v154_v19, 0.0 }
  0xff   :  { %157 = vadd.xlane.f32.xlu0 %v156_v20 }
 0x103   :  { %160 = vadd.xlane.f32.xlu0 %v159_v22 }
 0x188   :  { %v158_v23 = vpop.xlane.xlu0 %157 }
 0x189   :  { %v163_v24 = vmul.f32 0.03125, %v158_v23 }
 0x18b   :  { %v165_v25 = vsub.f32 %v154_v19, %v163_v24 }
 0x18c   :  { %v161_v26 = vpop.xlane.xlu0 %160 }
 0x18d   :  { %v164_v27 = vmul.f32 0.03125, %v161_v26  ;;  %v167_v28 = vmul.f32 %v165_v25, %v165_v25 }
 0x18f   :  { %v166_v29 = vsub.f32 %v155_v21, %v164_v27  ;;  %v169_v30 = vsel %vm64_vm0, %v167_v28, 0.0 }
 0x190   :  { %170 = vadd.xlane.f32.xlu1 %v169_v30 }
 0x191   :  { %v168_v31 = vmul.f32 %v166_v29, %v166_v29 }
 0x193   :  { %v172_v32 = vsel %vm64_vm0, %v168_v31, 0.0 }
 0x194   :  { %173 = vadd.xlane.f32.xlu1 %v172_v32 }
 0x219   :  { %v171_v33 = vpop.xlane.xlu1 %170 }
 0x21a   :  { %v175_v34 = vmul.f32 0.03125, %v171_v33 }
 0x21c   :  { %v177_v35 = vadd.f32 1e-12, %v175_v34 }
 0x21d   :  { %v174_v36 = vpop.xlane.xlu1 %173 }
 0x21e   :  { %250 = vrsqrt.f32 %v177_v35  ;;  %v176_v37 = vmul.f32 0.03125, %v174_v36 }
 0x220   :  { %v178_v38 = vadd.f32 1e-12, %v176_v37 }
 0x222   :  { %252 = vrsqrt.f32 %v178_v38 }
 0x22b   :  { %v251_v39 = vpop.eup %250 }
 0x22c   :  { %v181_v41 = vmul.f32 %v251_v39, %v165_v25 }
 0x22e   :  { %v189_v43 = vmul.f32 %v222_v40, %v181_v41 }
 0x22f   :  { %v253_v44 = vpop.eup %252 }
 0x230   :  { %v182_v45 = vmul.f32 %v253_v44, %v166_v29  ;;  %v197_v46 = vadd.f32 %v223_v42, %v189_v43 }
 0x232   :  { %v190_v47 = vmul.f32 %v222_v40, %v182_v45  ;;  %199 = vst.msk [vmem:[#allocation7] sm:$0xff] %vm64_vm0, %v197_v46 }
 0x234   :  { %v198_v48 = vadd.f32 %v223_v42, %v190_v47 }
 0x236   :  { %200 = vst.msk [vmem:[#allocation7 + $0x8] sm:$0xff] %vm64_vm0, %v198_v48 }
 0x237   :  { %305 = shalt.err (!%p302_p0)
}
 0x238   :  { %212 = dma.vmem_to_hbm [thread:$0]  %s207_s9, 256, %s395_s5, [#allocation4], %s321_s21, %s321_s21, %s322_s22  }
 0x239   :  { %318 = dma.done.wait [#allocation4], 256  }
 0x23a   :  { %319 = vsyncadd [#allocation4], 4294967040 }
 0x23b   :  { %216 = vsyncpa [#allocation3], 1 }
 0x23c   :  { %217 = vsyncpa [#allocation6], 1 }
 0x23d   :  { %218 = vsyncpa [#allocation4], 1 }

</bundles_post_ra>
